<compile_context>
chip_gen: v6e
topology: v6e:2x2x1
jax: 0.10.0
libtpu: 0.0.40
codegen_flags: <defaults>
</compile_context>

<pallas_src>
import functools
import math

import jax
import jax.numpy as jnp
from jax.experimental import pallas as pl
from jax.experimental.pallas import tpu as pltpu


def _vdrop_kernel(bits_ref, x_ref, o_ref, *, threshold: int, inv_keep: float):
    """bits_ref: (bB, 1, L) uint32 — one row of random bits per batch element.
    x_ref/o_ref: (bB, tS, L) in the input dtype.

    The same (bB, 1, L) bits block is presented for every seq tile of a batch
    element (its index_map ignores the seq-tile index), so the mask is
    identical across all timesteps — the variational-dropout invariant.
    Keep/drop is a pure unsigned-integer threshold compare; the multiply is
    done in f32 and cast once to the output dtype.
    """
    keep = bits_ref[...] < jnp.uint32(threshold)
    mask = jnp.where(keep, jnp.float32(inv_keep), jnp.float32(0.0))
    # (bB, 1, L) mask broadcasts over the seq (sublane) axis of (bB, tS, L).
    o_ref[...] = (x_ref[...].astype(jnp.float32) * mask).astype(o_ref.dtype)


def _target_block_bytes() -> int:
    """~4 MiB blocks on v7x (fast HBM, 2 TCs), ~2 MiB on v5e/v6e."""
    try:
        kind = jax.devices()[0].device_kind.lower()
    except Exception:  # pragma: no cover - defensive
        kind = ""
    if "v7" in kind:
        return 4 * 1024 * 1024
    return 2 * 1024 * 1024


def _choose_tiles(B, S, D, itemsize, target_bytes):
    """Pick (bB, tS) so one block is ~target_bytes (mem-bound streaming)."""
    row_bytes = max(D * itemsize, 1)
    seq_bytes = max(S * row_bytes, 1)
    if seq_bytes <= target_bytes:
        # Whole sequence fits; pack several batch rows per block to amortize
        # the fixed per-grid-step overhead, but keep at least ~4 blocks along
        # the parallel batch axis so v7x's two TensorCores both get work and
        # prefetch/writeback can overlap.
        tS = S
        bB = max(1, min(B, target_bytes // seq_bytes, pl.cdiv(B, 4)))
    else:
        # Tile the sequence axis; keep tS a multiple of 8 (sublane tiling).
        bB = 1
        tS = (target_bytes // row_bytes) // 8 * 8
        tS = max(8, min(tS, S))
    return bB, tS


def variational_dropout(x, key, dropout: float = 0.5, training: bool = True):
    """x: [B, S, D] float array. Same mask across all timesteps of a row."""
    assert 0 <= dropout <= 1, "Dropout must be in between 0 and 1"
    if not training or dropout == 0.0:
        return x
    if dropout == 1.0:
        return jnp.zeros_like(x)

    keep_prob = 1.0 - dropout
    B, S, D = x.shape

    # One row of 32-bit random bits per batch element; keep iff bits < thr.
    # (keep_prob is quantized to threshold/2^32 and clamped at 2^32-1; the
    # error is <= 2^-32 — negligible.)
    bits = jax.random.bits(key, (B, 1, D), dtype=jnp.uint32)
    threshold = min(int(round(keep_prob * (2 ** 32))), 2 ** 32 - 1)
    inv_keep = 1.0 / keep_prob

    # Lane-dense repack: view x as (B, S2, L) with L a multiple of 128. The
    # per-timestep mask pattern of length D is simply tiled L//D times, which
    # preserves "same mask for every timestep" exactly.
    L = math.lcm(D, 128)
    if (S * D) % L == 0:
        reps = L // D
        S2 = (S * D) // L
        x_in = x.reshape(B, S2, L)  # row-major, free in XLA
        bits_in = jnp.tile(bits, (1, 1, reps)) if reps > 1 else bits
        Lk = L
    else:
        # Fallback: sub-128-lane last dim (masked partial stores).
        # TODO(synk): pad D up to a multiple of 128 when S*D % lcm(D,128) != 0
        # and the tensor is large enough to amortize the pad copy.
        reps, S2, x_in, bits_in, Lk = 1, S, x, bits, D

    bB, tS = _choose_tiles(B, S2, Lk, jnp.dtype(x.dtype).itemsize,
                           _target_block_bytes())
    # Grid order matters: seq-tiles innermost so the bits block (whose
    # index_map ignores s) is reused across consecutive steps without re-DMA.
    grid = (pl.cdiv(B, bB), pl.cdiv(S2, tS))

    kernel = functools.partial(_vdrop_kernel, threshold=threshold,
                               inv_keep=inv_keep)

    out = pl.pallas_call(
        kernel,
        out_shape=jax.ShapeDtypeStruct((B, S2, Lk), x.dtype),
        grid=grid,
        in_specs=[
            # Same bits block for every seq tile -> identical mask over time.
            pl.BlockSpec((bB, 1, Lk), lambda b, s: (b, 0, 0)),
            pl.BlockSpec((bB, tS, Lk), lambda b, s: (b, s, 0)),
        ],
        out_specs=pl.BlockSpec((bB, tS, Lk), lambda b, s: (b, s, 0)),
        compiler_params=pltpu.CompilerParams(
            dimension_semantics=("parallel", "parallel"),
            vmem_limit_bytes=32 * 1024 * 1024,
        ),
    )(bits_in, x_in)

    if (S2, Lk) != (S, D):
        out = out.reshape(B, S, D)
    return out


def _check(x, out, keep_prob):
    """Mask identical across seq; values in {0, 1/keep_prob}."""
    ratio = out / x  # x ~ N(0,1): exact zeros vanishingly unlikely
    same_across_seq = bool(jnp.allclose(ratio, ratio[:, :1, :], atol=1e-5))
    inv = 1.0 / keep_prob
    vals_ok = bool(jnp.all((jnp.abs(ratio) < 1e-6)
                           | (jnp.abs(ratio - inv) < 1e-3)))
    return same_across_seq, vals_ok


if __name__ == "__main__":
    key = jax.random.PRNGKey(0)
    xkey, mkey, xkey2, mkey2 = jax.random.split(key, 4)

    # Main case (exercises the lane-dense reshape path: D=32 -> L=128).
    B, S, D = 2, 8, 32
    x = jax.random.normal(xkey, (B, S, D), dtype=jnp.float32)
    out = variational_dropout(x, mkey, dropout=0.5, training=True)
    out = jax.block_until_ready(out)
    assert out.shape == x.shape and out.dtype == x.dtype
    same, vals = _check(x, out, keep_prob=0.5)
    assert same, "mask differs across timesteps"
    assert vals, "mask values are not {0, 1/keep_prob}"

    # Fallback case (S*D not a multiple of lcm(D,128) -> sub-128-lane path).
    x2 = jax.random.normal(xkey2, (2, 3, 32), dtype=jnp.float32)
    out2 = jax.block_until_ready(
        variational_dropout(x2, mkey2, dropout=0.5, training=True))
    same2, vals2 = _check(x2, out2, keep_prob=0.5)
    assert same2 and vals2, "fallback path broke variational semantics"

    # Eval mode is identity.
    eval_out = variational_dropout(x, mkey, dropout=0.5, training=False)
    assert bool(jnp.array_equal(eval_out, x)), "eval mode must be identity"

    print("KERNEL_OK")
</pallas_src>

<mosaic_0001>
module attributes {stable_mosaic.version = 11 : i64} {
  func.func @_vdrop_kernel(%arg0: i32, %arg1: i32, %arg2: memref<1x1x128xi32, #tpu.memory_space<vmem>>, %arg3: memref<1x2x128xf32, #tpu.memory_space<vmem>>, %arg4: memref<1x2x128xf32, #tpu.memory_space<vmem>>) attributes {dimension_semantics = [#tpu.dimension_semantics<parallel>, #tpu.dimension_semantics<parallel>], iteration_bounds = array<i64: 2, 1>, scalar_prefetch = 0 : i64, scratch_operands = 0 : i64, tpu.core_type = #tpu.core_type<tc>, window_params = [{transform_indices = @transform_0, window_bounds = array<i64: 1, 1, 128>}, {transform_indices = @transform_1, window_bounds = array<i64: 1, 2, 128>}, {transform_indices = @transform_2, window_bounds = array<i64: 1, 2, 128>}]} {
    %c0 = arith.constant 0 : index
    %c0_0 = arith.constant 0 : index
    %c0_1 = arith.constant 0 : index
    %0 = vector.load %arg2[%c0, %c0_0, %c0_1] : memref<1x1x128xi32, #tpu.memory_space<vmem>>, vector<1x1x128xi32>
    %c-2147483648_i32 = arith.constant -2147483648 : i32
    %1 = vector.broadcast %c-2147483648_i32 : i32 to vector<1x1x128xi32>
    %2 = arith.cmpi ult, %0, %1 : vector<1x1x128xi32>
    %cst = arith.constant 2.000000e+00 : f32
    %cst_2 = arith.constant 0.000000e+00 : f32
    %3 = vector.broadcast %cst : f32 to vector<1x1x128xf32>
    %4 = vector.broadcast %cst_2 : f32 to vector<1x1x128xf32>
    %5 = arith.select %2, %3, %4 : vector<1x1x128xi1>, vector<1x1x128xf32>
    %c0_3 = arith.constant 0 : index
    %c0_4 = arith.constant 0 : index
    %c0_5 = arith.constant 0 : index
    %6 = vector.load %arg3[%c0_3, %c0_4, %c0_5] : memref<1x2x128xf32, #tpu.memory_space<vmem>>, vector<1x2x128xf32>
    %7 = vector.broadcast %5 : vector<1x1x128xf32> to vector<1x2x128xf32>
    %8 = arith.mulf %6, %7 : vector<1x2x128xf32>
    %c0_6 = arith.constant 0 : index
    %c0_7 = arith.constant 0 : index
    %c0_8 = arith.constant 0 : index
    %9 = vector.load %arg4[%c0_6, %c0_7, %c0_8] : memref<1x2x128xf32, #tpu.memory_space<vmem>>, vector<1x2x128xf32>
    tpu.vector_store %arg4[%c0_6, %c0_7, %c0_8], %8 {strides = array<i32>} : memref<1x2x128xf32, #tpu.memory_space<vmem>>, vector<1x2x128xf32>,
    return
  }
  func.func @transform_0(%arg0: i32, %arg1: i32) -> (i32, i32, i32) {
    %c0_i32 = arith.constant 0 : i32
    %c0_i32_0 = arith.constant 0 : i32
    %c0_i32_1 = arith.constant 0 : i32
    return %arg0, %c0_i32, %c0_i32_0 : i32, i32, i32
  }
  func.func @transform_1(%arg0: i32, %arg1: i32) -> (i32, i32, i32) {
    %c0_i32 = arith.constant 0 : i32
    %c0_i32_0 = arith.constant 0 : i32
    return %arg0, %arg1, %c0_i32 : i32, i32, i32
  }
  func.func @transform_2(%arg0: i32, %arg1: i32) -> (i32, i32, i32) {
    %c0_i32 = arith.constant 0 : i32
    %c0_i32_0 = arith.constant 0 : i32
    return %arg0, %arg1, %c0_i32 : i32, i32, i32
  }
}

</mosaic_0001>

<bundles_post_ra>
// kernel: tpu_custom_call.1
= control target key start
LH: loop header
LB: loop body
LE: loop exit
PB: predicated region body
PF: predicated region fallthrough
CT: control target
= control target key end

     0   :  { %7 = vsyncpa [#allocation3], 0  ;;  %s744_s0 = inlined_call_operand.hbm [shape: u32[2,1,128], index: 0, kind: input, shape index: {}]   ;;  %s745_s1 = inlined_call_operand.hbm [shape: f32[2,2,128], index: 1, kind: input, shape index: {}]   ;;  %s746_s2 = inlined_call_operand.hbm [shape: f32[2,2,128], index: 2, kind: output, shape index: {}]  }
   0x1   :  { %9 = vsyncpa [#allocation3 + $0x1], 0 }
   0x2   :  { %10 = vsyncpa [#allocation6], 0 }
   0x3   :  { %12 = vsyncpa [#allocation6 + $0x1], 0 }
   0x4   :  { %13 = vsyncpa [#allocation4], 0 }
   0x5   :  { %15 = vsyncpa [#allocation4 + $0x1], 0  ;;  %s580_s9 = smov 0   ;;  %s582_s10 = smov 0  }
   0x6   :  { %s584_s11 = smov 0   ;;  %s586_s12 = smov 0  }
   0x7   :  { %s588_s13 = smov 0   ;;  %s590_s14 = smov 0  }
   0x8 LB: > { %s337_s15 = sadd.s32 4294967295, %s559_s14   ;;  %s338_s16 = sadd.s32 4294967294, %s559_s14   ;;  %s559_s14 = sphi %s590_s14, %s21_s14   ;;  %s555_s13 = sphi %s588_s13, %s758_s13   ;;  %s551_s12 = sphi %s586_s12, %s757_s12   ;;  %s547_s11 = sphi %s584_s11, %s756_s11   ;;  %s543_s10 = sphi %s582_s10, %s755_s10   ;;  %s539_s9 = sphi %s580_s9, %s754_s9  }
   0x9   : > { %s33_s17 = sadd.s32 1, %s555_s13  ;;  %s40_s18 = sadd.s32 1, %s547_s11 }
   0xa   : > { %p35_p0 = scmp.ge.s32.totalorder %s33_s17, 2  ;;  %p47_p1 = scmp.ne.s32.totalorder %s547_s11, %s543_s10 }
   0xb   : > { %p48_p2 = scmp.eq.s32.totalorder %s559_s14, 0  ;;  %p53_p3 = scmp.ne.s32.totalorder %s543_s10, %s539_s9 }
   0xc   : > { %s760_s17 = smov (%p35_p0, %s33_s17), 0  ;;  %p54_p5 = scmp.eq.s32.totalorder %s337_s15, 0 }
   0xd   : > { %p621_p4 = por %p48_p2, %p47_p1  ;;  %s37_s20 = ssub.s32 %s555_s13, %s760_s17 }
   0xe   : > { %p107_p6 = scmp.eq.s32.totalorder %s337_s15, 1  ;;  %p38_p7 = scmp.eq.s32.totalorder %s37_s20, 0 }
   0xf   : > { %p627_p8 = por %p54_p5, %p53_p3  ;;  %p113_p10 = scmp.eq.s32.totalorder %s338_s16, 1 }
  0x10   : > { %p631_p9 = por %p107_p6, %p47_p1  ;;  %p368_p13 = scmp.lt.s32.totalorder %s559_s14, 2 }
  0x11   : > { %s636_s23 = scalar_select %p38_p7, %s547_s11, %s40_s18  }
  0x12   : > { %p638_p11 = por %p113_p10, %p53_p3  ;;  %s645_s25 = sand.u32 1, %s547_s11  }
  0x13   : > { %s341_s26 = sshll.u32 %s555_s13, 4  ;;  %s136_s27 = scalar_lea.vmem [#allocation2], %s645_s25 }
  0x14   : > { %s143_s28 = sshll.u32 %s136_s27, 4  ;;  %s141_s3 = scalar_lea.hbm %s744_s0, %s341_s26  ;;  %s144_s28 = int_to_ptr.vmem [resolvable:$true] %s143_s28 }
  0x15   : > { %p654_p0 = pnand %p368_p13, %p621_p4  ;;  %p344_p1 = scmp.ge.s32.totalorder %s559_s14, 1 }
  0x16   : > { %p167_p2 = scmp.lt.s32.totalorder %s559_s14, 3  ;;  %s342_s5 = sshll.u32 %s645_s25, 1 }
  0x17   : > { %s134_s6 = scalar_lea.sflag [#allocation3], %s645_s25  ;;  %p421_p3 = pneg %p654_p0 }
  0x18   : > { %s432_s7 = scalar_lea.vmem %s144_s28, 16  ;;  %s561_s8 = smov [#allocation2]  }
  0x19   : > { %p433_p5 = scmp.ne.s32.totalorder %s144_s28, %s432_s7  ;;  %s437_s15 = sshll.u32 %s561_s8, 4  ;;  %s438_s15 = int_to_ptr.vmem [resolvable:$false] %s437_s15 }
  0x1a   : > { %s439_s16 = scalar_lea.vmem %s438_s15, 32  ;;  %p440_p4 = scmp.lt.s32.totalorder %s144_s28, %s438_s15 }
  0x1b   : > { %p435_p6 = pnand %p433_p5, %p421_p3  ;;  %p441_p10 = scmp.lt.s32.totalorder %s439_s16, %s432_s7 }
  0x1d   : > { %p436_p7 = pneg %p435_p6  ;;  %p442_p13 = por %p441_p10, %p440_p4 }
  0x1f   : > { %p443_p12 = pnand %p442_p13, %p436_p7 }
  0x21   : > { %446 = shalt.err (!%p443_p12)
}
  0x22   : > { %360 = dma.hbm_to_vmem [thread:$0]  (!%p654_p0), %s141_s3, 16, %s144_s28, %s134_s6  }
  0x23   : > { %p673_p5 = pnand %p344_p1, %p167_p2  ;;  %s343_s19 = sshll.u32 %s555_s13, 5 }
  0x24   : > { %s154_s20 = scalar_lea.vmem [#allocation5], %s342_s5  ;;  %s160_s30 = scalar_lea.hbm %s745_s1, %s343_s19 }
  0x25   : > { %s162_s26 = sshll.u32 %s154_s20, 4  ;;  %s151_s7 = scalar_lea.sflag [#allocation6], %s645_s25  ;;  %s163_s26 = int_to_ptr.vmem [resolvable:$true] %s162_s26 }
  0x26   : > { %s460_s8 = scalar_lea.vmem %s163_s26, 32  ;;  %s562_s28 = smov [#allocation5]  }
  0x27   : > { %p461_p12 = scmp.ne.s32.totalorder %s163_s26, %s460_s8  ;;  %s465_s3 = sshll.u32 %s562_s28, 4  ;;  %s466_s3 = int_to_ptr.vmem [resolvable:$false] %s465_s3 }
  0x28   : > { %s467_s6 = scalar_lea.vmem %s466_s3, 64  ;;  %p468_p1 = scmp.lt.s32.totalorder %s163_s26, %s466_s3 }
  0x29   : > { %p463_p6 = pnand %p461_p12, %p421_p3  ;;  %p469_p2 = scmp.lt.s32.totalorder %s467_s6, %s460_s8 }
  0x2b   : > { %p464_p7 = pneg %p463_p6  ;;  %p470_p4 = por %p469_p2, %p468_p1 }
  0x2d   : > { %p471_p10 = pnand %p470_p4, %p464_p7 }
  0x2f   : > { %474 = shalt.err (!%p471_p10)
}
  0x30   : > { %363 = dma.hbm_to_vmem [thread:$0]  (!%p654_p0), %s160_s30, 32, %s163_s26, %s151_s7  }
  0x31   : > { %171 = sbr.rel (%p673_p5) target bundleno = 83 (0x53), region = 28  ;;  %s690_s25 = sand.u32 (!%p673_p5), 1, %s543_s10  }
  0x32   : > { %s174_s5 = scalar_lea.sflag (!%p673_p5), [#allocation3], %s690_s25  ;;  %s176_s15 = scalar_lea.vmem (!%p673_p5), [#allocation2], %s690_s25 }
  0x36   : > { %526 = dma.done.wait (%p627_p8), %s174_s5, 16  }
  0x37   : > { %528 = vsyncadd (%p627_p8), %s174_s5, 4294967280  ;;  %s345_s4 = sshll.u32 %s690_s25, 1  ;;  %s182_s16 = scalar_lea.sflag [#allocation6], %s690_s25 }
  0x38   : > { %s185_s18 = scalar_lea.vmem [#allocation5], %s345_s4 }
  0x39   : > { %530 = dma.done.wait (%p627_p8), %s182_s16, 32  }
  0x3a   : > { %532 = vsyncadd (%p627_p8), %s182_s16, 4294967264  ;;  %v215_v0 = vlaneseq  ;;  %v210_v3 = vld [vmem:[%s176_s15] sm:$0x1]  ;;  %v563_v4 = vmov 0.0   ;;  %v213_v6 = vld [vmem:[%s185_s18] sm:$0x3] }
  0x3b   : > { %vm211_vm0 = vcmp.lt.u32.totalorder %v210_v3, 2147483648  ;;  %s209_s19 = scalar_lea.vmem [#allocation7], %s345_s4  ;;  %s348_s26 = sshll.u32 %s551_s12, 5 }
  0x3c   : > { %v216_v1 = vshrl.u32 %v215_v0, 7  ;;  %v212_v5 = vsel %vm211_vm0, 2.0, %v563_v4  ;;  %s237_s20 = sshll.u32 %s209_s19, 4  ;;  %s235_s29 = scalar_lea.hbm %s746_s2, %s348_s26  ;;  %s238_s20 = int_to_ptr.vmem [resolvable:$true] %s237_s20 }
  0x3d   : > { %s223_s30 = scalar_lea.sflag [#allocation4], %s690_s25  ;;  %s475_s7 = scalar_lea.vmem %s238_s20, 32 }
  0x3e   : > { %v217_v2 = vsub.s32 0, %v216_v1  ;;  %p476_p8 = scmp.ne.s32.totalorder %s238_s20, %s475_s7  ;;  %s564_s8 = smov [#allocation7]  }
  0x3f   : > { %s479_s28 = sshll.u32 %s564_s8, 4  ;;  %s480_s28 = int_to_ptr.vmem [resolvable:$false] %s479_s28 }
  0x40   : > { %v218_v7 = vrot.slane %v212_v5, %v217_v2  ;;  %p477_p0 = pnand %p476_p8, %p631_p9  ;;  %s481_s3 = scalar_lea.vmem %s480_s28, 64 }
  0x41   : > { %p482_p13 = scmp.lt.s32.totalorder %s238_s20, %s480_s28  ;;  %p483_p5 = scmp.lt.s32.totalorder %s481_s3, %s475_s7 }
  0x42   : > { %v220_v8 = vmul.f32 %v218_v7, %v213_v6  ;;  %p478_p3 = pneg %p477_p0 }
  0x43   : > { %p484_p12 = por %p483_p5, %p482_p13 }
  0x44   : > { %221 = vst [vmem:[%s209_s19] sm:$0x3] %v220_v8 }
  0x45   : > { %p485_p6 = pnand %p484_p12, %p478_p3 }
  0x47   : > { %488 = shalt.err (!%p485_p6)
}
  0x48   : > { %s489_s12 = scalar_lea.hbm %s235_s29, 32  ;;  %s493_s5 = scalar_lea.hbm %s746_s2, 64 }
  0x49   : > { %p490_p7 = scmp.ne.s32.totalorder %s235_s29, %s489_s12  ;;  %p494_p4 = scmp.lt.s32.totalorder %s235_s29, %s746_s2 }
  0x4a   : > { %p495_p10 = scmp.lt.s32.totalorder %s493_s5, %s489_s12 }
  0x4b   : > { %p491_p1 = pnand %p490_p7, %p631_p9 }
  0x4c   : > { %p496_p8 = por %p495_p10, %p494_p4 }
  0x4d   : > { %p492_p2 = pneg %p491_p1 }
  0x4f   : > { %p497_p0 = pnand %p496_p8, %p492_p2 }
  0x51   : > { %500 = shalt.err (!%p497_p0)
}
  0x52   : > { %355 = dma.vmem_to_hbm [thread:$0]  (%p631_p9), %s238_s20, 32, %s235_s29, %s223_s30  }
  0x53 PF: > { %s249_s16 = sand.u32 1, %s539_s9   ;;  %p753_p3 = scmp.ge.s32.totalorder %s559_s14, 2 }
  0x54   : > { %s250_s18 = scalar_lea.sflag [#allocation4], %s249_s16 }
  0x55   : > { %p365_p13 = pnand %p753_p3, %p638_p11 }
  0x57   : > { %p366_p5 = pneg %p365_p13 }
  0x59   : > { %534 = dma.done.wait (%p366_p5), %s250_s18, 32  }
  0x5a   : > { %536 = vsyncadd (%p366_p5), %s250_s18, 4294967264  ;;  %s21_s14 = sadd.s32 1, %s559_s14   ;;  %s754_s9 = smov %s543_s10 }
  0x5b   : > { %p18_p12 = scmp.ge.s32.totalorder %s21_s14, 4   ;;  %s755_s10 = smov %s547_s11 }
  0x5c   : > { %s756_s11 = smov %s636_s23  ;;  %s757_s12 = smov %s555_s13 }
  0x5d   : > { %s758_s13 = smov %s760_s17  ;;  %20 = sbr.rel (!%p18_p12) target bundleno = 8 (0x8), region = 86 }
  0x62   :  { %255 = vsyncpa [#allocation3], 1 }
  0x63   :  { %257 = vsyncpa [#allocation3 + $0x1], 1 }
  0x64   :  { %258 = vsyncpa [#allocation6], 1 }
  0x65   :  { %260 = vsyncpa [#allocation6 + $0x1], 1 }
  0x66   :  { %261 = vsyncpa [#allocation4], 1 }
  0x67   :  { %263 = vsyncpa [#allocation4 + $0x1], 1 }

</bundles_post_ra>
